<compile_context>
chip_gen: v6e
topology: v6e:2x2x1
jax: 0.10.0
libtpu: 0.0.40
codegen_flags: <defaults>
</compile_context>

<pallas_src>
import functools

import jax
import jax.numpy as jnp
from jax import lax
from jax.experimental import pallas as pl
from jax.experimental.pallas import tpu as pltpu


def a3c_kernel(x_ref, w1_ref, b1_ref, w2_ref, b2_ref, wh_ref, bh_ref,
               out_ref, *, action_size):
    # Cast activations to bf16 right before each dot (free VPU work); weights
    # arrive pre-cast to bf16; accumulate in f32; elementwise stays f32
    # (v5e-safe VPU path).
    x = x_ref[...].astype(jnp.bfloat16)

    # Shared trunk: Linear -> ReLU -> Linear -> ReLU.
    h1 = jnp.dot(x, w1_ref[...], preferred_element_type=jnp.float32)
    h1 = jnp.maximum(h1 + b1_ref[...], 0.0)
    h2 = jnp.dot(h1.astype(jnp.bfloat16), w2_ref[...],
                 preferred_element_type=jnp.float32)
    h2 = jnp.maximum(h2 + b2_ref[...], 0.0)

    # Fused policy+value head: one (H, 128) matmul instead of an A-wide and a
    # 1-wide MXU pass.  Lane layout of `head`:
    #   lanes [0, A)   -> policy logits
    #   lane  A        -> value
    #   lanes (A, 128) -> zero padding
    head = jnp.dot(h2.astype(jnp.bfloat16), wh_ref[...],
                   preferred_element_type=jnp.float32) + bh_ref[...]

    lane = lax.broadcasted_iota(jnp.int32, head.shape, 1)
    is_policy = lane < action_size

    # Numerically-stable softmax over policy lanes only.  Padding uses a large
    # finite negative (not -inf) and an exact divide (not approx reciprocal)
    # so the result matches an exact softmax to f32 rounding.
    logits = jnp.where(is_policy, head, jnp.float32(-1e30))
    m = jnp.max(logits, axis=-1, keepdims=True)
    e = jnp.where(is_policy, jnp.exp(logits - m), 0.0)
    p = e / jnp.sum(e, axis=-1, keepdims=True)

    # Lane-dense (tile_b, 128) output slab -> unmasked vst on the store path.
    slab = jnp.where(is_policy, p, jnp.where(lane == action_size, head, 0.0))
    out_ref[...] = slab.astype(out_ref.dtype)


def _round_up(n, m):
    return ((n + m - 1) // m) * m


def _choose_tile_b(batch):
    """Batch-tile heuristic (see perf review).

    * small B: one tile of round_up(B, 8) rows -> no padded work, grid=(1,)
    * mid B:   two tiles so v7x's 2 TensorCores both get a grid step
    * large B: 256 rows fills the v6e/v7x 256-wide MXU M dimension (also fine
      on v5e's 4x128^2 MXUs)
    """
    b8 = _round_up(batch, 8)
    if b8 <= 64:
        return b8
    if b8 <= 512:
        return _round_up(pl.cdiv(b8, 2), 8)
    return 256


def a3c_forward(x, packed, *, tile_b=None):
    """x: (B, state_size) float32. packed: output of pack_params()."""
    B, S = x.shape
    A = packed["action_size"]
    head_w = packed["wh"].shape[1]          # A+1 padded to a multiple of 128
    hidden1 = packed["w1"].shape[1]
    hidden2 = packed["w2"].shape[1]

    if tile_b is None:
        tile_b = _choose_tile_b(B)
    tile_b = _round_up(tile_b, 8)
    b_pad = tile_b * pl.cdiv(B, tile_b)

    # Pad only if needed (to the tile multiple); x stays f32 — the bf16 cast
    # happens inside the kernel, so no extra wrapper-side HBM round trip.
    xb = x if b_pad == B else jnp.pad(x, ((0, b_pad - B), (0, 0)))

    # Right-sized VMEM budget from actual buffer math (double-buffered x/out
    # tiles + resident weights + f32 intermediate headroom), 2x safety margin,
    # floor 4 MiB, capped well below v7x's 64 MiB.
    weight_bytes = sum(
        packed[k].size * packed[k].dtype.itemsize
        for k in ("w1", "b1", "w2", "b2", "wh", "bh"))
    act_bytes = 2 * tile_b * S * 4 + 2 * tile_b * head_w * 4
    scratch_bytes = 6 * tile_b * max(hidden1, hidden2, head_w) * 4
    vmem_limit = int(min(
        max(2 * (2 * weight_bytes + act_bytes + scratch_bytes), 4 << 20),
        48 << 20))

    kernel = functools.partial(a3c_kernel, action_size=A)
    const = lambda i: (0, 0)   # weights/biases VMEM-resident across grid steps

    out = pl.pallas_call(
        kernel,
        out_shape=jax.ShapeDtypeStruct((b_pad, head_w), jnp.float32),
        grid_spec=pltpu.PrefetchScalarGridSpec(
            num_scalar_prefetch=0,
            grid=(b_pad // tile_b,),
            in_specs=[
                pl.BlockSpec((tile_b, S), lambda i: (i, 0)),     # x tile (f32)
                pl.BlockSpec((S, hidden1), const),               # w1 (bf16)
                pl.BlockSpec((1, hidden1), const),               # b1 (f32)
                pl.BlockSpec((hidden1, hidden2), const),         # w2 (bf16)
                pl.BlockSpec((1, hidden2), const),               # b2 (f32)
                pl.BlockSpec((hidden2, head_w), const),          # fused head W
                pl.BlockSpec((1, head_w), const),                # fused head b
            ],
            out_specs=pl.BlockSpec((tile_b, head_w), lambda i: (i, 0)),
        ),
        compiler_params=pltpu.CompilerParams(
            dimension_semantics=("parallel",),   # batch tiles across v7x TCs
            vmem_limit_bytes=vmem_limit,
        ),
    )(xb, packed["w1"], packed["b1"], packed["w2"], packed["b2"],
      packed["wh"], packed["bh"])

    policy = out[:B, :A]
    value = out[:B, A:A + 1]
    return policy, value


def init_params(key, state_size, action_size, hidden_layers=(128, 128)):
    """Deterministic init mirroring nn.Linear's U(-1/sqrt(fan_in), 1/sqrt(fan_in))."""
    params = {}
    dims = [state_size] + list(hidden_layers)

    def linear_init(k, fan_in, fan_out):
        kw, kb = jax.random.split(k)
        bound = 1.0 / jnp.sqrt(fan_in)
        w = jax.random.uniform(kw, (fan_in, fan_out), jnp.float32, -bound, bound)
        b = jax.random.uniform(kb, (1, fan_out), jnp.float32, -bound, bound)
        return w, b

    keys = jax.random.split(key, len(hidden_layers) + 2)
    for i in range(len(hidden_layers)):
        w, b = linear_init(keys[i], dims[i], dims[i + 1])
        params[f"w{i+1}"] = w
        params[f"b{i+1}"] = b
    params["wp"], params["bp"] = linear_init(keys[-2], dims[-1], action_size)
    params["wv"], params["bv"] = linear_init(keys[-1], dims[-1], 1)
    return params


def pack_params(params, action_size):
    """bf16 weights + fused (policy || value) head zero-padded to 128 lanes."""
    head_in = params["wp"].shape[0]
    head_w = 128 * pl.cdiv(action_size + 1, 128)

    wh = jnp.zeros((head_in, head_w), jnp.float32)
    wh = wh.at[:, :action_size].set(params["wp"])
    wh = wh.at[:, action_size:action_size + 1].set(params["wv"])

    bh = jnp.zeros((1, head_w), jnp.float32)
    bh = bh.at[:, :action_size].set(params["bp"])
    bh = bh.at[:, action_size].set(params["bv"][0, 0])

    return {
        "w1": params["w1"].astype(jnp.bfloat16),
        "b1": params["b1"],                      # biases stay f32
        "w2": params["w2"].astype(jnp.bfloat16),
        "b2": params["b2"],
        "wh": wh.astype(jnp.bfloat16),
        "bh": bh,
        "action_size": action_size,
    }


if __name__ == "__main__":
    # Small shapes consistent with the module's forward: (batch, state_size).
    B, STATE_SIZE, ACTION_SIZE = 8, 16, 8
    HIDDEN = (128, 128)

    key = jax.random.PRNGKey(0)
    kx, kp = jax.random.split(key)
    x = jax.random.normal(kx, (B, STATE_SIZE), jnp.float32)
    params = init_params(kp, STATE_SIZE, ACTION_SIZE, HIDDEN)
    packed = pack_params(params, ACTION_SIZE)

    policy, value = jax.block_until_ready(a3c_forward(x, packed))

    # Pure-JAX reference mirroring the kernel's bf16-operand / f32-accumulate
    # math (only residual differences are accumulation order).
    xb = x.astype(jnp.bfloat16)
    h = jnp.maximum(
        jnp.dot(xb, packed["w1"], preferred_element_type=jnp.float32)
        + packed["b1"], 0.0)
    h = jnp.maximum(
        jnp.dot(h.astype(jnp.bfloat16), packed["w2"],
                preferred_element_type=jnp.float32) + packed["b2"], 0.0)
    head = jnp.dot(h.astype(jnp.bfloat16), packed["wh"],
                   preferred_element_type=jnp.float32) + packed["bh"]
    ref_policy = jax.nn.softmax(head[:, :ACTION_SIZE], axis=-1)
    ref_value = head[:, ACTION_SIZE:ACTION_SIZE + 1]

    assert policy.shape == (B, ACTION_SIZE) and value.shape == (B, 1)
    assert jnp.allclose(policy, ref_policy, atol=2e-3, rtol=2e-3)
    assert jnp.allclose(value, ref_value, atol=2e-3, rtol=2e-3)
    assert jnp.allclose(jnp.sum(policy, axis=-1), 1.0, atol=1e-3)

    print("KERNEL_OK")
</pallas_src>

<mosaic_0001>
module attributes {stable_mosaic.version = 11 : i64} {
  func.func @a3c_kernel(%arg0: i32, %arg1: memref<8x16xf32, #tpu.memory_space<vmem>>, %arg2: memref<16x128xbf16, #tpu.memory_space<vmem>>, %arg3: memref<1x128xf32, #tpu.memory_space<vmem>>, %arg4: memref<128x128xbf16, #tpu.memory_space<vmem>>, %arg5: memref<1x128xf32, #tpu.memory_space<vmem>>, %arg6: memref<128x128xbf16, #tpu.memory_space<vmem>>, %arg7: memref<1x128xf32, #tpu.memory_space<vmem>>, %arg8: memref<8x128xf32, #tpu.memory_space<vmem>>) attributes {dimension_semantics = [#tpu.dimension_semantics<parallel>], iteration_bounds = array<i64: 1>, scalar_prefetch = 0 : i64, scratch_operands = 0 : i64, tpu.core_type = #tpu.core_type<tc>, window_params = [{transform_indices = @transform_0, window_bounds = array<i64: 8, 16>}, {pipeline_mode = #tpu.pipeline_mode<synchronous>, transform_indices = @transform_1, window_bounds = array<i64: 16, 128>}, {pipeline_mode = #tpu.pipeline_mode<synchronous>, transform_indices = @transform_2, window_bounds = array<i64: 1, 128>}, {pipeline_mode = #tpu.pipeline_mode<synchronous>, transform_indices = @transform_3, window_bounds = array<i64: 128, 128>}, {pipeline_mode = #tpu.pipeline_mode<synchronous>, transform_indices = @transform_4, window_bounds = array<i64: 1, 128>}, {pipeline_mode = #tpu.pipeline_mode<synchronous>, transform_indices = @transform_5, window_bounds = array<i64: 128, 128>}, {pipeline_mode = #tpu.pipeline_mode<synchronous>, transform_indices = @transform_6, window_bounds = array<i64: 1, 128>}, {transform_indices = @transform_7, window_bounds = array<i64: 8, 128>}]} {
    %c0 = arith.constant 0 : index
    %c0_0 = arith.constant 0 : index
    %0 = vector.load %arg1[%c0, %c0_0] : memref<8x16xf32, #tpu.memory_space<vmem>>, vector<8x16xf32>
    %1 = arith.truncf %0 : vector<8x16xf32> to vector<8x16xbf16>
    %c0_1 = arith.constant 0 : index
    %c0_2 = arith.constant 0 : index
    %2 = vector.load %arg2[%c0_1, %c0_2] : memref<16x128xbf16, #tpu.memory_space<vmem>>, vector<16x128xbf16>
    %cst = arith.constant dense<0.000000e+00> : vector<8x128xf32>
    %3 = tpu.matmul %1, %2, %cst {dimension_numbers = #tpu.dot_dimension_numbers<[1], [0], [0], [1], [0, 0, 1, 1], [], []>} : vector<8x16xbf16>, vector<16x128xbf16>, vector<8x128xf32> -> vector<8x128xf32>
    %c0_3 = arith.constant 0 : index
    %c0_4 = arith.constant 0 : index
    %4 = vector.load %arg3[%c0_3, %c0_4] : memref<1x128xf32, #tpu.memory_space<vmem>>, vector<1x128xf32>
    %5 = vector.broadcast %4 : vector<1x128xf32> to vector<8x128xf32>
    %6 = arith.addf %3, %5 : vector<8x128xf32>
    %cst_5 = arith.constant 0.000000e+00 : f32
    %7 = vector.broadcast %cst_5 : f32 to vector<8x128xf32>
    %8 = arith.maximumf %6, %7 : vector<8x128xf32>
    %9 = arith.truncf %8 : vector<8x128xf32> to vector<8x128xbf16>
    %c0_6 = arith.constant 0 : index
    %c0_7 = arith.constant 0 : index
    %10 = vector.load %arg4[%c0_6, %c0_7] : memref<128x128xbf16, #tpu.memory_space<vmem>>, vector<128x128xbf16>
    %cst_8 = arith.constant dense<0.000000e+00> : vector<8x128xf32>
    %11 = tpu.matmul %9, %10, %cst_8 {dimension_numbers = #tpu.dot_dimension_numbers<[1], [0], [0], [1], [0, 0, 1, 1], [], []>} : vector<8x128xbf16>, vector<128x128xbf16>, vector<8x128xf32> -> vector<8x128xf32>
    %c0_9 = arith.constant 0 : index
    %c0_10 = arith.constant 0 : index
    %12 = vector.load %arg5[%c0_9, %c0_10] : memref<1x128xf32, #tpu.memory_space<vmem>>, vector<1x128xf32>
    %13 = vector.broadcast %12 : vector<1x128xf32> to vector<8x128xf32>
    %14 = arith.addf %11, %13 : vector<8x128xf32>
    %cst_11 = arith.constant 0.000000e+00 : f32
    %15 = vector.broadcast %cst_11 : f32 to vector<8x128xf32>
    %16 = arith.maximumf %14, %15 : vector<8x128xf32>
    %17 = arith.truncf %16 : vector<8x128xf32> to vector<8x128xbf16>
    %c0_12 = arith.constant 0 : index
    %c0_13 = arith.constant 0 : index
    %18 = vector.load %arg6[%c0_12, %c0_13] : memref<128x128xbf16, #tpu.memory_space<vmem>>, vector<128x128xbf16>
    %cst_14 = arith.constant dense<0.000000e+00> : vector<8x128xf32>
    %19 = tpu.matmul %17, %18, %cst_14 {dimension_numbers = #tpu.dot_dimension_numbers<[1], [0], [0], [1], [0, 0, 1, 1], [], []>} : vector<8x128xbf16>, vector<128x128xbf16>, vector<8x128xf32> -> vector<8x128xf32>
    %c0_15 = arith.constant 0 : index
    %c0_16 = arith.constant 0 : index
    %20 = vector.load %arg7[%c0_15, %c0_16] : memref<1x128xf32, #tpu.memory_space<vmem>>, vector<1x128xf32>
    %21 = vector.broadcast %20 : vector<1x128xf32> to vector<8x128xf32>
    %22 = arith.addf %19, %21 : vector<8x128xf32>
    %23 = tpu.iota {dimensions = array<i32: 1>} : vector<8x128xi32>
    %c8_i32 = arith.constant 8 : i32
    %24 = vector.broadcast %c8_i32 : i32 to vector<8x128xi32>
    %25 = arith.cmpi slt, %23, %24 : vector<8x128xi32>
    %cst_17 = arith.constant -1.000000e+30 : f32
    %26 = vector.broadcast %cst_17 : f32 to vector<8x128xf32>
    %27 = arith.select %25, %22, %26 : vector<8x128xi1>, vector<8x128xf32>
    %cst_18 = arith.constant dense<0xFF800000> : vector<8xf32>
    %28 = vector.multi_reduction <maximumf>, %27, %cst_18 [1] : vector<8x128xf32> to vector<8xf32>
    %29 = vector.shape_cast %28 : vector<8xf32> to vector<8x1xf32>
    %30 = vector.broadcast %29 : vector<8x1xf32> to vector<8x128xf32>
    %31 = arith.subf %27, %30 : vector<8x128xf32>
    %32 = math.exp %31 : vector<8x128xf32>
    %cst_19 = arith.constant 0.000000e+00 : f32
    %33 = vector.broadcast %cst_19 : f32 to vector<8x128xf32>
    %34 = arith.select %25, %32, %33 : vector<8x128xi1>, vector<8x128xf32>
    %cst_20 = arith.constant dense<0.000000e+00> : vector<8xf32>
    %35 = vector.multi_reduction <add>, %34, %cst_20 [1] : vector<8x128xf32> to vector<8xf32>
    %36 = vector.shape_cast %35 : vector<8xf32> to vector<8x1xf32>
    %37 = vector.broadcast %36 : vector<8x1xf32> to vector<8x128xf32>
    %38 = arith.divf %34, %37 : vector<8x128xf32>
    %c8_i32_21 = arith.constant 8 : i32
    %39 = vector.broadcast %c8_i32_21 : i32 to vector<8x128xi32>
    %40 = arith.cmpi eq, %23, %39 : vector<8x128xi32>
    %cst_22 = arith.constant 0.000000e+00 : f32
    %41 = vector.broadcast %cst_22 : f32 to vector<8x128xf32>
    %42 = arith.select %40, %22, %41 : vector<8x128xi1>, vector<8x128xf32>
    %43 = arith.select %25, %38, %42 : vector<8x128xi1>, vector<8x128xf32>
    %c0_23 = arith.constant 0 : index
    %c0_24 = arith.constant 0 : index
    %44 = vector.load %arg8[%c0_23, %c0_24] : memref<8x128xf32, #tpu.memory_space<vmem>>, vector<8x128xf32>
    tpu.vector_store %arg8[%c0_23, %c0_24], %43 {strides = array<i32>} : memref<8x128xf32, #tpu.memory_space<vmem>>, vector<8x128xf32>,
    return
  }
  func.func @transform_0(%arg0: i32) -> (i32, i32) {
    %c0_i32 = arith.constant 0 : i32
    %c0_i32_0 = arith.constant 0 : i32
    return %arg0, %c0_i32 : i32, i32
  }
  func.func @transform_1(%arg0: i32) -> (i32, i32) {
    %c0_i32 = arith.constant 0 : i32
    %c0_i32_0 = arith.constant 0 : i32
    %c0_i32_1 = arith.constant 0 : i32
    return %c0_i32, %c0_i32_0 : i32, i32
  }
  func.func @transform_2(%arg0: i32) -> (i32, i32) {
    %c0_i32 = arith.constant 0 : i32
    %c0_i32_0 = arith.constant 0 : i32
    %c0_i32_1 = arith.constant 0 : i32
    return %c0_i32, %c0_i32_0 : i32, i32
  }
  func.func @transform_3(%arg0: i32) -> (i32, i32) {
    %c0_i32 = arith.constant 0 : i32
    %c0_i32_0 = arith.constant 0 : i32
    %c0_i32_1 = arith.constant 0 : i32
    return %c0_i32, %c0_i32_0 : i32, i32
  }
  func.func @transform_4(%arg0: i32) -> (i32, i32) {
    %c0_i32 = arith.constant 0 : i32
    %c0_i32_0 = arith.constant 0 : i32
    %c0_i32_1 = arith.constant 0 : i32
    return %c0_i32, %c0_i32_0 : i32, i32
  }
  func.func @transform_5(%arg0: i32) -> (i32, i32) {
    %c0_i32 = arith.constant 0 : i32
    %c0_i32_0 = arith.constant 0 : i32
    %c0_i32_1 = arith.constant 0 : i32
    return %c0_i32, %c0_i32_0 : i32, i32
  }
  func.func @transform_6(%arg0: i32) -> (i32, i32) {
    %c0_i32 = arith.constant 0 : i32
    %c0_i32_0 = arith.constant 0 : i32
    %c0_i32_1 = arith.constant 0 : i32
    return %c0_i32, %c0_i32_0 : i32, i32
  }
  func.func @transform_7(%arg0: i32) -> (i32, i32) {
    %c0_i32 = arith.constant 0 : i32
    %c0_i32_0 = arith.constant 0 : i32
    return %arg0, %c0_i32 : i32, i32
  }
}

</mosaic_0001>

<bundles_post_ra>
// kernel: tpu_custom_call.1
= control target key start
LH: loop header
LB: loop body
LE: loop exit
PB: predicated region body
PF: predicated region fallthrough
CT: control target
= control target key end

     0   :  { %12 = vsyncpa [#allocation3], 0  ;;  %s733_s0 = inlined_call_operand.hbm [shape: f32[8,16], index: 0, kind: input, shape index: {}]   ;;  %s734_s1 = inlined_call_operand.hbm [shape: bf16[16,128], index: 1, kind: input, shape index: {}]   ;;  %s735_s2 = inlined_call_operand.vmem [shape: f32[1,128], index: 2, kind: input, shape index: {}]   ;;  %s736_s3 = inlined_call_operand.hbm [shape: bf16[128,128], index: 3, kind: input, shape index: {}]   ;;  %s737_s4 = inlined_call_operand.vmem [shape: f32[1,128], index: 4, kind: input, shape index: {}]   ;;  %s738_s5 = inlined_call_operand.hbm [shape: bf16[128,128], index: 5, kind: input, shape index: {}]   ;;  %s739_s6 = inlined_call_operand.vmem [shape: f32[1,128], index: 6, kind: input, shape index: {}]   ;;  %s740_s7 = inlined_call_operand.hbm [shape: f32[8,128], index: 7, kind: output, shape index: {}]  }
   0x1   :  { %13 = vsyncpa [#allocation6], 0 }
   0x2   :  { %14 = vsyncpa [#allocation9], 0 }
   0x3   :  { %15 = vsyncpa [#allocation4], 0  ;;  %s628_s24 = smov [#allocation5]  }
   0x4   :  { %s31_s25 = sshll.u32 %s628_s24, 4  ;;  %s32_s25 = int_to_ptr.vmem [resolvable:$true] %s31_s25 }
   0x5   :  { %s528_s26 = scalar_lea.vmem %s32_s25, 128  ;;  %p533_p1 = scmp.lt.s32.totalorder %s32_s25, %s32_s25 }
   0x6   :  { %p529_p0 = scmp.ne.s32.totalorder %s32_s25, %s528_s26  ;;  %p534_p2 = scmp.lt.s32.totalorder %s528_s26, %s528_s26 }
   0x8   :  { %p535_p3 = por %p534_p2, %p533_p1 }
   0xa   :  { %p536_p4 = pnand %p535_p3, %p529_p0 }
   0xc   :  { %539 = shalt.err (!%p536_p4)
}
   0xd   :  { %s629_s27 = smov 64   ;;  %s630_s28 = smov 4  }
   0xe   :  { %37 = dma.hbm_to_vmem [thread:$0]  %s734_s1, 128, %s32_s25, [#allocation6], %s629_s27, %s629_s27, %s630_s28  }
   0xf   :  { %s631_s8 = smov [#allocation2]   ;;  %s632_s10 = smov [#allocation7]  }
  0x10   :  { %s22_s9 = sshll.u32 %s631_s8, 4  ;;  %s45_s11 = sshll.u32 %s632_s10, 4  ;;  %s23_s9 = int_to_ptr.vmem [resolvable:$true] %s22_s9  ;;  %s46_s11 = int_to_ptr.vmem [resolvable:$true] %s45_s11 }
  0x11   :  { %s548_s12 = scalar_lea.vmem %s23_s9, 128  ;;  %p553_p6 = scmp.lt.s32.totalorder %s23_s9, %s23_s9 }
  0x12   :  { %p549_p5 = scmp.ne.s32.totalorder %s23_s9, %s548_s12  ;;  %p554_p7 = scmp.lt.s32.totalorder %s548_s12, %s548_s12 }
  0x14   :  { %p555_p8 = por %p554_p7, %p553_p6 }
  0x16   :  { %p556_p9 = pnand %p555_p8, %p549_p5 }
  0x18   :  { %559 = shalt.err (!%p556_p9)
}
  0x19   :  { %25 = dma.hbm_to_vmem [thread:$0]  %s733_s0, 128, %s23_s9, [#allocation3]  }
  0x1a   :  { %s568_s15 = scalar_lea.vmem %s46_s11, 1024  ;;  %p573_p11 = scmp.lt.s32.totalorder %s46_s11, %s46_s11 }
  0x1b   :  { %p569_p10 = scmp.ne.s32.totalorder %s46_s11, %s568_s15  ;;  %p574_p12 = scmp.lt.s32.totalorder %s568_s15, %s568_s15 }
  0x1d   :  { %p575_p13 = por %p574_p12, %p573_p11 }
  0x1f   :  { %p576_p0 = pnand %p575_p13, %p569_p10 }
  0x21   :  { %579 = shalt.err (!%p576_p0)
}
  0x22   :  { %51 = dma.hbm_to_vmem [thread:$0]  %s736_s3, 1024, %s46_s11, [#allocation6], %s629_s27, %s629_s27, %s630_s28  }
  0x23   :  { %s633_s17 = smov [#allocation8]  }
  0x24   :  { %s59_s18 = sshll.u32 %s633_s17, 4  ;;  %s60_s18 = int_to_ptr.vmem [resolvable:$true] %s59_s18 }
  0x25   :  { %s588_s19 = scalar_lea.vmem %s60_s18, 1024  ;;  %p593_p2 = scmp.lt.s32.totalorder %s60_s18, %s60_s18 }
  0x26   :  { %p589_p1 = scmp.ne.s32.totalorder %s60_s18, %s588_s19  ;;  %p594_p3 = scmp.lt.s32.totalorder %s588_s19, %s588_s19 }
  0x28   :  { %p595_p4 = por %p594_p3, %p593_p2 }
  0x2a   :  { %p596_p5 = pnand %p595_p4, %p589_p1 }
  0x2c   :  { %599 = shalt.err (!%p596_p5)
}
  0x2d   :  { %65 = dma.hbm_to_vmem [thread:$0]  %s738_s5, 1024, %s60_s18, [#allocation9], %s629_s27, %s629_s27, %s630_s28  }
  0x2e   :  { %620 = dma.done.wait [#allocation3], 128  }
  0x2f   :  { %621 = vsyncadd [#allocation3], 4294967168 }
  0x30   :  { %622 = dma.done.wait [#allocation6], 1152  }
  0x31   :  { %623 = vsyncadd [#allocation6], 4294966144 }
  0x32   :  { %624 = dma.done.wait [#allocation9], 1024  }
  0x33   :  { %625 = vsyncadd [#allocation9], 4294966272  ;;  %v634_v0 = vmov 0.0   ;;  %vm635_vm0 = vmmov 0   ;;  %v499_v1 = vld [vmem:[#allocation5] sm:$0xff]   ;;  %v81_v2 = vld [vmem:[#allocation2] sm:$0xff]  ;;  %v368_v36 = vlaneseq }
  0x34   :  { %444 = vmatprep.subr.bf16.mxu0 %v634_v0  ;;  %446 = vmatprep.mubr.msk.bf16.mxu0 %vm635_vm0, %v634_v0  ;;  %v82_v3 = vpack.c.bf16 %v81_v2, %v81_v2  ;;  %vm98_vm1 = vcmask 130048   ;;  %v500_v4 = vld [vmem:[#allocation7 + $0x38] sm:$0xff]   ;;  %v501_v5 = vld [vmem:[#allocation7 + $0x30] sm:$0xff]   ;;  %v502_v6 = vld [vmem:[#allocation7 + $0x28] sm:$0xff]  }
  0x35   :  { %450 = vmatprep.subr.bf16.mxu1 %v634_v0  ;;  %466 = vmatprep.mubr.msk.bf16.mxu1 %vm635_vm0, %v634_v0  ;;  %v503_v7 = vld [vmem:[#allocation7 + $0x20] sm:$0xff]   ;;  %v504_v8 = vld [vmem:[#allocation7 + $0x18] sm:$0xff]   ;;  %v505_v9 = vld [vmem:[#allocation7 + $0x10] sm:$0xff]   ;;  %v369_v37 = vand.u32 127, %v368_v36 }
  0x36   :  { %445 = vmatpush3.bf16.msra.mxu0 %v499_v1  ;;  %451 = vmatpush3.bf16.msra.mxu1 %v500_v4  ;;  %v506_v10 = vld [vmem:[#allocation7 + $0x8] sm:$0xff]   ;;  %v507_v11 = vld [vmem:[#allocation7] sm:$0xff]   ;;  %v508_v12 = vld [vmem:[#allocation8 + $0x38] sm:$0xff]  }
  0x37   :  { %470 = vmatprep.subr.bf16.mxu0 %v634_v0  ;;  %452 = vmatprep.subr.bf16.mxu1 %v634_v0  ;;  %v509_v13 = vld [vmem:[#allocation8 + $0x30] sm:$0xff]   ;;  %v510_v14 = vld [vmem:[#allocation8 + $0x28] sm:$0xff]   ;;  %v511_v15 = vld [vmem:[#allocation8 + $0x20] sm:$0xff]   ;;  %vm382_vm2 = vcmp.eq.s32.totalorder %v369_v37, 8  ;;  %vm370_vm3 = vcmp.lt.s32.totalorder %v369_v37, 8 }
  0x38   :  { %v512_v16 = vld [vmem:[#allocation8 + $0x18] sm:$0xff]   ;;  %v513_v17 = vld [vmem:[#allocation8 + $0x10] sm:$0xff]   ;;  %v514_v26 = vld [vmem:[#allocation8 + $0x8] sm:$0xff]  }
  0x39   :  { %447 = vmatmul.mubr.msk.bf16.vlgmr.msra.gmra.mxu0 %vm98_vm1, %v82_v3  ;;  %v403_v18 = vld [vmem:[%s735_s2] ss:$0 sm:$0xff]  ;;  %v515_v27 = vld [vmem:[#allocation8] sm:$0xff]  }
  0x3a   :  { %486 = vmatprep.mubr.msk.bf16.mxu0 %vm635_vm0, %v634_v0  ;;  %453 = vmatpush3.bf16.msra.mxu1 %v501_v5  ;;  %v406_v28 = vld [vmem:[%s737_s4] ss:$0 sm:$0xff]  ;;  %s636_s4 = smov [#allocation10]  }
  0x3b   :  { %454 = vmatprep.subr.bf16.mxu1 %v634_v0  ;;  %471 = vmatpush3.bf16.msra.mxu0 %v508_v12  ;;  %v415_v38 = vld [vmem:[%s739_s6] ss:$0 sm:$0xff]  ;;  %s392_s6 = sshll.u32 %s636_s4, 4  ;;  %s393_s6 = int_to_ptr.vmem [resolvable:$true] %s392_s6 }
  0x3c   :  { %472 = vmatprep.subr.bf16.mxu0 %v634_v0  ;;  %s600_s24 = scalar_lea.vmem %s393_s6, 128  ;;  %p605_p7 = scmp.lt.s32.totalorder %s393_s6, %s393_s6 }
  0x3d   :  { %p601_p6 = scmp.ne.s32.totalorder %s393_s6, %s600_s24  ;;  %p606_p8 = scmp.lt.s32.totalorder %s600_s24, %s600_s24 }
  0x3e   :  { %455 = vmatpush3.bf16.msra.mxu1 %v502_v6 }
  0x3f   :  { %456 = vmatprep.subr.bf16.mxu1 %v634_v0  ;;  %473 = vmatpush3.bf16.msra.mxu0 %v509_v13  ;;  %p607_p9 = por %p606_p8, %p605_p7 }
  0x40   :  { %474 = vmatprep.subr.bf16.mxu0 %v634_v0 }
  0x41   :  { %p608_p10 = pnand %p607_p9, %p601_p6 }
  0x42   :  { %457 = vmatpush3.bf16.msra.mxu1 %v503_v7 }
  0x43   :  { %458 = vmatprep.subr.bf16.mxu1 %v634_v0  ;;  %475 = vmatpush3.bf16.msra.mxu0 %v510_v14 }
  0x44   :  { %476 = vmatprep.subr.bf16.mxu0 %v634_v0 }
  0x46   :  { %459 = vmatpush3.bf16.msra.mxu1 %v504_v8 }
  0x47   :  { %460 = vmatprep.subr.bf16.mxu1 %v634_v0  ;;  %477 = vmatpush3.bf16.msra.mxu0 %v511_v15 }
  0x48   :  { %478 = vmatprep.subr.bf16.mxu0 %v634_v0 }
  0x4a   :  { %461 = vmatpush3.bf16.msra.mxu1 %v505_v9 }
  0x4b   :  { %462 = vmatprep.subr.bf16.mxu1 %v634_v0  ;;  %479 = vmatpush3.bf16.msra.mxu0 %v512_v16 }
  0x4c   :  { %480 = vmatprep.subr.bf16.mxu0 %v634_v0 }
  0x4e   :  { %463 = vmatpush3.bf16.msra.mxu1 %v506_v10 }
  0x4f   :  { %464 = vmatprep.subr.bf16.mxu1 %v634_v0  ;;  %481 = vmatpush3.bf16.msra.mxu0 %v513_v17 }
  0x50   :  { %482 = vmatprep.subr.bf16.mxu0 %v634_v0 }
  0x52   :  { %465 = vmatpush3.bf16.msra.mxu1 %v507_v11 }
  0x53   :  { %483 = vmatpush3.bf16.msra.mxu0 %v514_v26 }
  0x54   :  { %484 = vmatprep.subr.bf16.mxu0 %v634_v0 }
  0x57   :  { %485 = vmatpush3.bf16.msra.mxu0 %v515_v27 }
  0xf9   :  { %v136_v19 = vpop.f32.mrf.mxu0 }
  0xfa   :  { %v137_v20 = vadd.f32 %v403_v18, %v136_v19 }
  0xfb   :  { %v448_v21 = vpop.f32.mrf.mxu0 }
  0xfc   :  { %v142_v22 = vmax.f32 %v137_v20, 0.0 }
  0xfd   :  { %v139_v23 = vpop.f32.mrf.mxu0 }
  0xfe   :  { %v143_v24 = vpack.c.bf16 %v142_v22, %v142_v22 }
  0xff   :  { %v449_v25 = vpop.f32.mrf.mxu0 }
 0x100   :  { %467 = vmatmul.mubr.bf16.vlgmr.msra.gmra.mxu1 %v143_v24 }
 0x1c0   :  { %v249_v29 = vpop.f32.mrf.mxu1 }
 0x1c1   :  { %v250_v30 = vadd.f32 %v406_v28, %v249_v29 }
 0x1c2   :  { %v468_v31 = vpop.f32.mrf.mxu1 }
 0x1c3   :  { %v255_v32 = vmax.f32 %v250_v30, 0.0 }
 0x1c4   :  { %v252_v33 = vpop.f32.mrf.mxu1 }
 0x1c5   :  { %v256_v34 = vpack.c.bf16 %v255_v32, %v255_v32 }
 0x1c6   :  { %v469_v35 = vpop.f32.mrf.mxu1 }
 0x1c7   :  { %487 = vmatmul.mubr.bf16.vlgmr.msra.gmra.mxu0 %v256_v34 }
 0x287   :  { %v362_v39 = vpop.f32.mrf.mxu0 }
 0x288   :  { %v363_v40 = vadd.f32 %v415_v38, %v362_v39 }
 0x289   :  { %v488_v41 = vpop.f32.mrf.mxu0 }
 0x28a   :  { %v383_v42 = vsel %vm382_vm2, %v363_v40, 0.0  ;;  %v371_v43 = vsel %vm370_vm3, %v363_v40, -1e+30 }
 0x28b   :  { %372 = vmax.xlane.f32.xlu0 %v371_v43  ;;  %v365_v44 = vpop.f32.mrf.mxu0 }
 0x28d   :  { %v489_v45 = vpop.f32.mrf.mxu0 }
 0x314   :  { %v373_v46 = vpop.xlane.xlu0 %372 }
 0x315   :  { %v374_v47 = vsub.f32 %v371_v43, %v373_v46 }
 0x317   :  { %v375_v48 = vmul.f32 1.442695, %v374_v47 }
 0x319   :  { %516 = vpow2.f32 %v375_v48 }
 0x326   :  { %v517_v49 = vpop.eup %516 }
 0x327   :  { %v377_v50 = vsel %vm370_vm3, %v517_v49, 0.0 }
 0x328   :  { %378 = vadd.xlane.f32.xlu0 %v377_v50 }
 0x3b1   :  { %v379_v51 = vpop.xlane.xlu0 %378 }
 0x3b2   :  { %518 = vrcp.f32 %v379_v51 }
 0x3bf   :  { %v519_v52 = vpop.eup %518 }
 0x3c0   :  { %v381_v53 = vmul.f32 %v519_v52, %v377_v50 }
 0x3c2   :  { %v384_v54 = vsel %vm370_vm3, %v381_v53, %v383_v42 }
 0x3c3   :  { %385 = vst [vmem:[#allocation10] sm:$0xff] %v384_v54 }
 0x3c4   :  { %611 = shalt.err (!%p608_p10)
}
 0x3c5   :  { %395 = dma.vmem_to_hbm [thread:$0]  %s393_s6, 128, %s740_s7, [#allocation4]  }
 0x3c6   :  { %626 = dma.done.wait [#allocation4], 128  }
 0x3c7   :  { %627 = vsyncadd [#allocation4], 4294967168 }
 0x3c8   :  { %399 = vsyncpa [#allocation3], 1 }
 0x3c9   :  { %400 = vsyncpa [#allocation6], 1 }
 0x3ca   :  { %401 = vsyncpa [#allocation9], 1 }
 0x3cb   :  { %402 = vsyncpa [#allocation4], 1 }

</bundles_post_ra>
